<compile_context>
chip_gen: v6e
topology: v6e:2x2x1
jax: 0.10.0
libtpu: 0.0.40
codegen_flags: <defaults>
</compile_context>

<pallas_src>
import jax
import jax.numpy as jnp
from jax import lax
from jax.experimental import pallas as pl
from jax.experimental.pallas import tpu as pltpu


def _round_up(a, m):
    return ((a + m - 1) // m) * m


def _correlation_kernel(x_ref, y_ref, o_ref):
    """Accumulates the partial Gram-matrix difference for one K split.

    x_ref, y_ref : (B, tk) tiles in native dtype.
    o_ref        : (B, B) f32 resident output block (one per split).
    """
    k = pl.program_id(1)

    @pl.when(k == 0)
    def _init():
        o_ref[...] = jnp.zeros_like(o_ref)

    x = x_ref[...]
    y = y_ref[...]

    # Contract both operands on their last (lane) dim: (B, tk) x (B, tk) -> (B, B).
    # No transpose/relayout is materialized; MXU accumulates in f32.
    dn = (((1,), (1,)), ((), ()))
    gxx = lax.dot_general(x, x, dimension_numbers=dn,
                          preferred_element_type=jnp.float32)
    gyy = lax.dot_general(y, y, dimension_numbers=dn,
                          preferred_element_type=jnp.float32)
    o_ref[...] += gxx - gyy


def correlation_loss(x, y, *, batch_size, param=0.001, tk=16384, num_splits=2):
    """Pallas implementation of Correlation.forward((x, y)).

    Note: like the PyTorch module's forward, `param` is stored but NOT applied
    to the returned loss.
    """
    del param  # interface parity with the nn.Module __init__; unused in forward

    assert x.size == y.size, "x and y must have the same number of elements"
    assert x.size % batch_size == 0, "total size must be divisible by batch_size"

    # Pure glue: flatten to (B, K) in native dtype (no f32 upcast in HBM).
    x_r = jnp.reshape(x, (batch_size, -1))
    y_r = jnp.reshape(y, (batch_size, -1))
    B, K = x_r.shape
    assert y_r.shape == (B, K), "x and y must flatten to the same (B, K)"
    itemsize = x_r.dtype.itemsize

    # ---- Tile-size selection (lane-dense, VMEM-budgeted) --------------------
    # Multiple of 128, no larger than (padded) K, and sized so that
    # 2 inputs x 2 pipeline buffers stay well inside VMEM on every generation
    # (v7x has only 64 MiB physical; keep input buffers under ~16 MiB).
    tk = max(128, _round_up(min(tk, K), 128))
    while 4 * B * tk * itemsize > 16 * 1024 * 1024 and tk > 128:
        tk = max(128, (tk // 2 // 128) * 128)

    # ---- Split the K reduction across a leading parallel axis ---------------
    num_tiles = (K + tk - 1) // tk
    if num_tiles < num_splits:
        num_splits = 1
    num_tiles = _round_up(num_tiles, num_splits)
    K_pad = num_tiles * tk
    if K_pad != K:
        # Zero-padding the feature axis is exact for Gram matrices.
        pad = K_pad - K
        x_r = jnp.pad(x_r, ((0, 0), (0, pad)))
        y_r = jnp.pad(y_r, ((0, 0), (0, pad)))
    tiles_per_split = num_tiles // num_splits

    # ---- Explicit VMEM budget ------------------------------------------------
    in_bytes = 2 * 2 * B * tk * itemsize          # 2 inputs x double-buffer
    out_bytes = 2 * 2 * B * B * 4                 # resident (B,B) f32 out block
    needed = in_bytes + out_bytes
    vmem_limit = int(min(max(2 * needed, 32 * 1024 * 1024), 64 * 1024 * 1024))

    partials = pl.pallas_call(
        _correlation_kernel,
        out_shape=jax.ShapeDtypeStruct((num_splits, B, B), jnp.float32),
        grid_spec=pltpu.PrefetchScalarGridSpec(
            num_scalar_prefetch=0,
            grid=(num_splits, tiles_per_split),
            in_specs=[
                pl.BlockSpec((B, tk), lambda s, k: (0, s * tiles_per_split + k)),
                pl.BlockSpec((B, tk), lambda s, k: (0, s * tiles_per_split + k)),
            ],
            out_specs=pl.BlockSpec((pl.Squeezed(), B, B), lambda s, k: (s, 0, 0)),
        ),
        compiler_params=pltpu.CompilerParams(
            dimension_semantics=("parallel", "arbitrary"),
            vmem_limit_bytes=vmem_limit,
        ),
    )(x_r, y_r)

    # Trivial finalize in plain JAX: sum per-split partial (Cxx-Cyy), scale,
    # Frobenius norm.
    diff = jnp.sum(partials, axis=0) / jnp.float32(batch_size)
    return jnp.sqrt(jnp.sum(diff * diff))


def correlation_loss_ref(x, y, *, batch_size):
    x_r = jnp.reshape(x, (batch_size, -1)).astype(jnp.float32)
    y_r = jnp.reshape(y, (batch_size, -1)).astype(jnp.float32)
    cxx = x_r @ x_r.T / batch_size
    cyy = y_r @ y_r.T / batch_size
    return jnp.sqrt(jnp.sum((cxx - cyy) ** 2))


if __name__ == "__main__":
    key = jax.random.PRNGKey(0)

    # Test 1: batch=8, channels=4, spatial=16x16 -> (B, K) = (8, 1024),
    # single large tile / single split.
    B, C, H, W = 8, 4, 16, 16
    kx, ky, kx2, ky2 = jax.random.split(key, 4)
    x = jax.random.normal(kx, (B, C, H, W), dtype=jnp.float32)  # NCHW, like PyTorch
    y = jax.random.normal(ky, (B, C, H, W), dtype=jnp.float32)

    loss = jax.block_until_ready(correlation_loss(x, y, batch_size=B, param=0.001))
    ref = correlation_loss_ref(x, y, batch_size=B)
    assert jnp.allclose(loss, ref, rtol=1e-5, atol=1e-5), (loss, ref)

    # Test 2: same data, small tk override -> exercises the two-split
    # ("parallel") axis and multi-tile reduction path.
    loss2 = jax.block_until_ready(
        correlation_loss(x, y, batch_size=B, param=0.001, tk=256))
    assert jnp.allclose(loss2, ref, rtol=1e-5, atol=1e-5), (loss2, ref)

    # Test 3: K = 300 (not a multiple of 128) -> exercises zero-padding +
    # split padding.
    x3 = jax.random.normal(kx2, (B, 3, 10, 10), dtype=jnp.float32)
    y3 = jax.random.normal(ky2, (B, 3, 10, 10), dtype=jnp.float32)
    loss3 = jax.block_until_ready(
        correlation_loss(x3, y3, batch_size=B, param=0.001, tk=128))
    ref3 = correlation_loss_ref(x3, y3, batch_size=B)
    assert jnp.allclose(loss3, ref3, rtol=1e-5, atol=1e-5), (loss3, ref3)

    print("KERNEL_OK")
</pallas_src>

<mosaic_0001>
module attributes {stable_mosaic.version = 11 : i64} {
  func.func @_correlation_kernel(%arg0: i32, %arg1: i32, %arg2: memref<8x1024xf32, #tpu.memory_space<vmem>>, %arg3: memref<8x1024xf32, #tpu.memory_space<vmem>>, %arg4: memref<1x8x8xf32, #tpu.memory_space<vmem>>) attributes {dimension_semantics = [#tpu.dimension_semantics<parallel>, #tpu.dimension_semantics<arbitrary>], iteration_bounds = array<i64: 1, 1>, scalar_prefetch = 0 : i64, scratch_operands = 0 : i64, tpu.core_type = #tpu.core_type<tc>, window_params = [{transform_indices = @transform_0, window_bounds = array<i64: 8, 1024>}, {transform_indices = @transform_1, window_bounds = array<i64: 8, 1024>}, {transform_indices = @transform_2, window_bounds = array<i64: 1, 8, 8>}]} {
    %c0_i32 = arith.constant 0 : i32
    %0 = arith.cmpi eq, %arg1, %c0_i32 : i32
    %1 = arith.extui %0 : i1 to i32
    %c0_i32_0 = arith.constant 0 : i32
    %2 = arith.cmpi ne, %1, %c0_i32_0 : i32
    scf.if %2 {
      %cst_11 = arith.constant 0.000000e+00 : f32
      %14 = vector.broadcast %cst_11 : f32 to vector<8x8xf32>
      %c0_12 = arith.constant 0 : index
      %c0_13 = arith.constant 0 : index
      %c0_14 = arith.constant 0 : index
      %15 = vector.load %arg4[%c0_12, %c0_13, %c0_14] : memref<1x8x8xf32, #tpu.memory_space<vmem>>, vector<1x8x8xf32>
      %16 = vector.shape_cast %15 : vector<1x8x8xf32> to vector<8x8xf32>
      %17 = vector.shape_cast %14 : vector<8x8xf32> to vector<1x8x8xf32>
      tpu.vector_store %arg4[%c0_12, %c0_13, %c0_14], %17 {strides = array<i32>} : memref<1x8x8xf32, #tpu.memory_space<vmem>>, vector<1x8x8xf32>,
    } else {
    }
    %c0 = arith.constant 0 : index
    %c0_1 = arith.constant 0 : index
    %3 = vector.load %arg2[%c0, %c0_1] : memref<8x1024xf32, #tpu.memory_space<vmem>>, vector<8x1024xf32>
    %c0_2 = arith.constant 0 : index
    %c0_3 = arith.constant 0 : index
    %4 = vector.load %arg3[%c0_2, %c0_3] : memref<8x1024xf32, #tpu.memory_space<vmem>>, vector<8x1024xf32>
    %cst = arith.constant dense<0.000000e+00> : vector<8x8xf32>
    %5 = tpu.matmul %3, %3, %cst {dimension_numbers = #tpu.dot_dimension_numbers<[1], [1], [0], [0], [0, 0, 1, 0], [], []>} : vector<8x1024xf32>, vector<8x1024xf32>, vector<8x8xf32> -> vector<8x8xf32>
    %cst_4 = arith.constant dense<0.000000e+00> : vector<8x8xf32>
    %6 = tpu.matmul %4, %4, %cst_4 {dimension_numbers = #tpu.dot_dimension_numbers<[1], [1], [0], [0], [0, 0, 1, 0], [], []>} : vector<8x1024xf32>, vector<8x1024xf32>, vector<8x8xf32> -> vector<8x8xf32>
    %c0_5 = arith.constant 0 : index
    %c0_6 = arith.constant 0 : index
    %c0_7 = arith.constant 0 : index
    %7 = vector.load %arg4[%c0_5, %c0_6, %c0_7] : memref<1x8x8xf32, #tpu.memory_space<vmem>>, vector<1x8x8xf32>
    %8 = vector.shape_cast %7 : vector<1x8x8xf32> to vector<8x8xf32>
    %9 = arith.subf %5, %6 : vector<8x8xf32>
    %10 = arith.addf %8, %9 : vector<8x8xf32>
    %c0_8 = arith.constant 0 : index
    %c0_9 = arith.constant 0 : index
    %c0_10 = arith.constant 0 : index
    %11 = vector.load %arg4[%c0_8, %c0_9, %c0_10] : memref<1x8x8xf32, #tpu.memory_space<vmem>>, vector<1x8x8xf32>
    %12 = vector.shape_cast %11 : vector<1x8x8xf32> to vector<8x8xf32>
    %13 = vector.shape_cast %10 : vector<8x8xf32> to vector<1x8x8xf32>
    tpu.vector_store %arg4[%c0_8, %c0_9, %c0_10], %13 {strides = array<i32>} : memref<1x8x8xf32, #tpu.memory_space<vmem>>, vector<1x8x8xf32>,
    return
  }
  func.func @transform_0(%arg0: i32, %arg1: i32) -> (i32, i32) {
    %c1_i32 = arith.constant 1 : i32
    %0 = arith.muli %arg0, %c1_i32 : i32
    %1 = arith.addi %0, %arg1 : i32
    %c0_i32 = arith.constant 0 : i32
    %c0_i32_0 = arith.constant 0 : i32
    return %c0_i32, %1 : i32, i32
  }
  func.func @transform_1(%arg0: i32, %arg1: i32) -> (i32, i32) {
    %c1_i32 = arith.constant 1 : i32
    %0 = arith.muli %arg0, %c1_i32 : i32
    %1 = arith.addi %0, %arg1 : i32
    %c0_i32 = arith.constant 0 : i32
    %c0_i32_0 = arith.constant 0 : i32
    return %c0_i32, %1 : i32, i32
  }
  func.func @transform_2(%arg0: i32, %arg1: i32) -> (i32, i32, i32) {
    %c0_i32 = arith.constant 0 : i32
    %c0_i32_0 = arith.constant 0 : i32
    %c0_i32_1 = arith.constant 0 : i32
    return %arg0, %c0_i32, %c0_i32_0 : i32, i32, i32
  }
}

</mosaic_0001>

<bundles_post_ra>
// kernel: tpu_custom_call.1
= control target key start
LH: loop header
LB: loop body
LE: loop exit
PB: predicated region body
PF: predicated region fallthrough
CT: control target
= control target key end

     0   :  { %7 = vsyncpa [#allocation3], 0  ;;  %s751_s0 = inlined_call_operand.hbm [shape: f32[8,1024], index: 0, kind: input, shape index: {}]   ;;  %s752_s1 = inlined_call_operand.hbm [shape: f32[8,1024], index: 1, kind: input, shape index: {}]   ;;  %s753_s2 = inlined_call_operand.hbm [shape: f32[1,8,8], index: 2, kind: output, shape index: {}]  }
   0x1   :  { %8 = vsyncpa [#allocation6], 0 }
   0x2   :  { %9 = vsyncpa [#allocation4], 0  ;;  %s721_s9 = smov [#allocation2]   ;;  %s722_s11 = smov [#allocation5]  }
   0x3   :  { %s20_s10 = sshll.u32 %s721_s9, 4  ;;  %s34_s12 = sshll.u32 %s722_s11, 4  ;;  %s21_s10 = int_to_ptr.vmem [resolvable:$true] %s20_s10  ;;  %s35_s12 = int_to_ptr.vmem [resolvable:$true] %s34_s12 }
   0x4   :  { %s663_s13 = scalar_lea.vmem %s21_s10, 1024  ;;  %p668_p1 = scmp.lt.s32.totalorder %s21_s10, %s21_s10 }
   0x5   :  { %p664_p0 = scmp.ne.s32.totalorder %s21_s10, %s663_s13  ;;  %p669_p2 = scmp.lt.s32.totalorder %s663_s13, %s663_s13 }
   0x7   :  { %p670_p3 = por %p669_p2, %p668_p1 }
   0x9   :  { %p671_p4 = pnand %p670_p3, %p664_p0 }
   0xb   :  { %674 = shalt.err (!%p671_p4)
}
   0xc   :  { %23 = dma.hbm_to_vmem [thread:$0]  %s751_s0, 1024, %s21_s10, [#allocation3]  }
   0xd   :  { %s683_s16 = scalar_lea.vmem %s35_s12, 1024  ;;  %p688_p6 = scmp.lt.s32.totalorder %s35_s12, %s35_s12 }
   0xe   :  { %p684_p5 = scmp.ne.s32.totalorder %s35_s12, %s683_s16  ;;  %p689_p7 = scmp.lt.s32.totalorder %s683_s16, %s683_s16 }
  0x10   :  { %p690_p8 = por %p689_p7, %p688_p6 }
  0x12   :  { %p691_p9 = pnand %p690_p8, %p684_p5 }
  0x14   :  { %694 = shalt.err (!%p691_p9)
}
  0x15   :  { %37 = dma.hbm_to_vmem [thread:$0]  %s752_s1, 1024, %s35_s12, [#allocation6]  }
  0x16   :  { %715 = dma.done.wait [#allocation3], 1024  }
  0x17   :  { %716 = vsyncadd [#allocation3], 4294966272 }
  0x18   :  { %717 = dma.done.wait [#allocation6], 1024  }
  0x19   :  { %718 = vsyncadd [#allocation6], 4294966272  ;;  %v55_v0 = vld [vmem:[#allocation2 + $0x8] sm:$0xff]  ;;  %v54_v1 = vld [vmem:[#allocation2] sm:$0xff]  ;;  %vm52_vm0 = vcmask 64512   ;;  %v723_v16 = vmov 0.0  }
  0x1a   :  { %v57_v2 = vld [vmem:[#allocation2 + $0x18] sm:$0xff]  ;;  %100 = vmatprep.subr.mxu0 %v55_v0  ;;  %v56_v3 = vld [vmem:[#allocation2 + $0x10] sm:$0xff]  ;;  %v59_v4 = vld [vmem:[#allocation2 + $0x28] sm:$0xff]  ;;  %134 = vmatprep.mubr.f32.mxu0 %v55_v0  ;;  %53 = vst.msk [vmem:[#allocation7] sm:$0xff] %vm52_vm0, %v723_v16  ;;  %s724_s0 = smov [#allocation7]  }
  0x1b   :  { %170 = vmatprep.subr.mxu1 %v57_v2  ;;  %101 = vmatpush1.xpose.msra.mxu0 %v54_v1  ;;  %v61_v5 = vld [vmem:[#allocation2 + $0x38] sm:$0xff]  ;;  %v58_v6 = vld [vmem:[#allocation2 + $0x20] sm:$0xff]  ;;  %v60_v7 = vld [vmem:[#allocation2 + $0x30] sm:$0xff]  ;;  %s641_s1 = sshll.u32 %s724_s0, 4  ;;  %s642_s1 = int_to_ptr.vmem [resolvable:$true] %s641_s1 }
  0x1c   :  { %171 = vmatpush1.xpose.msra.mxu1 %v56_v3  ;;  %204 = vmatprep.mubr.f32.mxu1 %v57_v2  ;;  %v63_v8 = vld [vmem:[#allocation5 + $0x8] sm:$0xff]  ;;  %v65_v9 = vld [vmem:[#allocation5 + $0x18] sm:$0xff]  ;;  %v62_v10 = vld [vmem:[#allocation5] sm:$0xff]  ;;  %s695_s19 = scalar_lea.vmem %s642_s1, 128  ;;  %p700_p11 = scmp.lt.s32.totalorder %s642_s1, %s642_s1 }
  0x1d   :  { %240 = vmatprep.subr.mxu0 %v59_v4  ;;  %310 = vmatprep.subr.mxu1 %v61_v5  ;;  %v64_v11 = vld [vmem:[#allocation5 + $0x10] sm:$0xff]  ;;  %v67_v12 = vld [vmem:[#allocation5 + $0x28] sm:$0xff]  ;;  %v69_v13 = vld [vmem:[#allocation5 + $0x38] sm:$0xff]  ;;  %p696_p10 = scmp.ne.s32.totalorder %s642_s1, %s695_s19  ;;  %p701_p12 = scmp.lt.s32.totalorder %s695_s19, %s695_s19 }
  0x1e   :  { %135 = vmatmul.mubr.f32.vlgmr.msra.gmra.mxu0 %v54_v1  ;;  %v66_v14 = vld [vmem:[#allocation5 + $0x20] sm:$0xff]  ;;  %v68_v15 = vld [vmem:[#allocation5 + $0x30] sm:$0xff] }
  0x1f   :  { %205 = vmatmul.mubr.f32.vlgmr.msra.gmra.mxu1 %v56_v3  ;;  %241 = vmatpush1.xpose.msra.mxu0 %v58_v6  ;;  %p702_p13 = por %p701_p12, %p700_p11 }
  0x20   :  { %311 = vmatpush1.xpose.msra.mxu1 %v60_v7  ;;  %274 = vmatprep.mubr.f32.mxu0 %v59_v4 }
  0x21   :  { %344 = vmatprep.mubr.f32.mxu1 %v61_v5  ;;  %380 = vmatprep.subr.mxu0 %v63_v8  ;;  %v630_v39 = vld [vmem:[#allocation7] sm:$0xff]  ;;  %p703_p0 = pnand %p702_p13, %p696_p10 }
  0x22   :  { %450 = vmatprep.subr.mxu1 %v65_v9  ;;  %275 = vmatmul.mubr.f32.vlgmr.msra.gmra.mxu0 %v58_v6 }
  0x23   :  { %345 = vmatmul.mubr.f32.vlgmr.msra.gmra.mxu1 %v60_v7  ;;  %381 = vmatpush1.xpose.msra.mxu0 %v62_v10 }
  0x24   :  { %451 = vmatpush1.xpose.msra.mxu1 %v64_v11  ;;  %414 = vmatprep.mubr.f32.mxu0 %v63_v8 }
  0x25   :  { %484 = vmatprep.mubr.f32.mxu1 %v65_v9  ;;  %520 = vmatprep.subr.mxu0 %v67_v12 }
  0x26   :  { %590 = vmatprep.subr.mxu1 %v69_v13  ;;  %415 = vmatmul.mubr.f32.vlgmr.msra.gmra.mxu0 %v62_v10 }
  0x27   :  { %485 = vmatmul.mubr.f32.vlgmr.msra.gmra.mxu1 %v64_v11  ;;  %521 = vmatpush1.xpose.msra.mxu0 %v66_v14 }
  0x28   :  { %591 = vmatpush1.xpose.msra.mxu1 %v68_v15  ;;  %554 = vmatprep.mubr.f32.mxu0 %v67_v12 }
  0x29   :  { %624 = vmatprep.mubr.f32.mxu1 %v69_v13 }
  0x2a   :  { %555 = vmatmul.mubr.f32.vlgmr.msra.gmra.mxu0 %v66_v14 }
  0x2b   :  { %625 = vmatmul.mubr.f32.vlgmr.msra.gmra.mxu1 %v68_v15 }
  0xde   :  { %v136_v17 = vpop.f32.mrf.mxu0 }
  0xdf   :  { %v206_v18 = vpop.f32.mrf.mxu1 }
  0xe0   :  { %v138_v19 = vpop.f32.mrf.mxu0  ;;  %v207_v27 = vadd.f32 %v206_v18, %v136_v17 }
  0xe1   :  { %v208_v20 = vpop.f32.mrf.mxu1 }
  0xe2   :  { %v276_v21 = vpop.f32.mrf.mxu0 }
  0xe3   :  { %v346_v22 = vpop.f32.mrf.mxu1  ;;  %v277_v30 = vadd.f32 %v276_v21, %v207_v27 }
  0xe4   :  { %v278_v23 = vpop.f32.mrf.mxu0 }
  0xe5   :  { %v348_v24 = vpop.f32.mrf.mxu1  ;;  %v347_v37 = vadd.f32 %v346_v22, %v277_v30 }
  0xe6   :  { %v416_v25 = vpop.f32.mrf.mxu0 }
  0xe7   :  { %v486_v26 = vpop.f32.mrf.mxu1 }
  0xe8   :  { %v418_v28 = vpop.f32.mrf.mxu0  ;;  %v487_v31 = vadd.f32 %v486_v26, %v416_v25 }
  0xe9   :  { %v488_v29 = vpop.f32.mrf.mxu1 }
  0xea   :  { %v556_v32 = vpop.f32.mrf.mxu0 }
  0xeb   :  { %v626_v33 = vpop.f32.mrf.mxu1  ;;  %v557_v34 = vadd.f32 %v556_v32, %v487_v31 }
  0xec   :  { %v558_v35 = vpop.f32.mrf.mxu0 }
  0xed   :  { %v628_v36 = vpop.f32.mrf.mxu1  ;;  %v627_v38 = vadd.f32 %v626_v33, %v557_v34 }
  0xef   :  { %v631_v40 = vsub.f32 %v347_v37, %v627_v38 }
  0xf1   :  { %v632_v41 = vadd.f32 %v631_v40, %v630_v39 }
  0xf3   :  { %634 = vst.msk [vmem:[#allocation7] sm:$0xff] %vm52_vm0, %v632_v41 }
  0xf4   :  { %706 = shalt.err (!%p703_p0)
}
  0xf5   :  { %644 = dma.vmem_to_hbm [thread:$0]  %s642_s1, 128, %s753_s2, [#allocation4]  }
  0xf6   :  { %719 = dma.done.wait [#allocation4], 128  }
  0xf7   :  { %720 = vsyncadd [#allocation4], 4294967168 }
  0xf8   :  { %648 = vsyncpa [#allocation3], 1 }
  0xf9   :  { %649 = vsyncpa [#allocation6], 1 }
  0xfa   :  { %650 = vsyncpa [#allocation4], 1 }

</bundles_post_ra>
